<compile_context>
chip_gen: v7x
topology: tpu7x:2x2x1
jax: 0.10.0
libtpu: 0.0.40
codegen_flags: <defaults>
</compile_context>

<pallas_src>
import functools

import jax
import jax.numpy as jnp
from jax.experimental import pallas as pl
from jax.experimental.pallas import tpu as pltpu


def _attend(q, k, v, bias, scale):
    """Folded-head scores -> exact softmax -> PV.  Shapes: q (TB, P, Dk),
    k (TB, N, Dk), v (TB, N, Dv), bias (1 or TB, P, N) f32 additive."""
    # Scores on the MXU, f32 accumulation; contraction on the last dims of both
    # operands (no per-head k transpose).
    s = jnp.einsum("bpd,bnd->bpn", q, k,
                   preferred_element_type=jnp.float32)
    s = s * scale + bias            # 0 keep / -1e9 user mask / -inf cross-head

    # Exact softmax over keys (approx reciprocal dropped: it broke the 1e-3
    # numerical check and deviates from F.softmax).
    m = jnp.max(s, axis=-1, keepdims=True)
    e = jnp.exp(s - m)              # cross-head entries become exactly 0
    p = e / jnp.sum(e, axis=-1, keepdims=True)

    p_cast = p.astype(v.dtype)      # single cast, reused by PV matmul and attn
    out = jnp.einsum("bpn,bnd->bpd", p_cast, v,
                     preferred_element_type=jnp.float32)
    return p_cast, out


def _sdpa_kernel(q_ref, k_ref, v_ref, bias_ref, fold_ref, o_ref, a_ref, *, scale):
    p_cast, out = _attend(q_ref[...], k_ref[...], v_ref[...], bias_ref[...], scale)
    o_ref[...] = out.astype(o_ref.dtype)

    # Per-head attention via one tiny MXU matmul: fold[n, kk] == 1 iff flat key
    # column n is within-head key kk.  Cross-head probabilities are exactly 0,
    # so this picks out the block diagonal without lane-split reshapes.
    tb, P, N = p_cast.shape
    lk = fold_ref.shape[-1]
    a2 = jnp.dot(p_cast.reshape(tb * P, N), fold_ref[...],
                 preferred_element_type=jnp.float32)
    a_ref[...] = a2.reshape(tb, P, lk).astype(a_ref.dtype)


def _sdpa_kernel_noattn(q_ref, k_ref, v_ref, bias_ref, o_ref, *, scale):
    _, out = _attend(q_ref[...], k_ref[...], v_ref[...], bias_ref[...], scale)
    o_ref[...] = out.astype(o_ref.dtype)


def scaled_dot_product_attention(q, k, v, temperature, mask=None, *,
                                 return_attn=True,
                                 vmem_budget_bytes=8 * 1024 * 1024):
    """q: [B,H,Lq,Dk], k: [B,H,Lk,Dk], v: [B,H,Lk,Dv].
    mask (optional): 4-D, broadcastable to [B,H,Lq,Lk]; nonzero = keep.
    Returns (output [B,H,Lq,Dv], attn [B,H,Lq,Lk]) or just output if
    return_attn=False."""
    B, H, Lq, Dk = q.shape
    Lk = k.shape[2]
    Dv = v.shape[3]
    P, N = H * Lq, H * Lk
    dtype = q.dtype
    itemsize = jnp.dtype(dtype).itemsize
    scale = float(1.0 / temperature)          # static python float (no captured consts)

    # ---- fold heads into the matmul; contiguous reshapes are free in XLA.
    qf = q.reshape(B, P, Dk)
    kf = k.reshape(B, N, Dk)
    vf = v.reshape(B, N, Dv)

    # ---- additive score bias: 0 keep, -1e9 user mask, -inf off the head-diagonal.
    qh = jnp.arange(P, dtype=jnp.int32) // Lq
    kh = jnp.arange(N, dtype=jnp.int32) // Lk
    same_head = qh[:, None] == kh[None, :]                       # (P, N) bool
    if mask is None:
        bias = jnp.where(same_head, 0.0, -jnp.inf).astype(jnp.float32)[None]  # (1,P,N)
    else:
        mask = jnp.asarray(mask)
        keep = jnp.broadcast_to(mask != 0, (B, H, Lq, Lk))        # bool
        user = jnp.where(keep, 0.0, -1e9)[:, :, :, None, :]       # (B,H,Lq,1,Lk)
        cross = same_head.reshape(H, Lq, H, Lk)[None]             # (1,H,Lq,H,Lk)
        bias = jnp.where(cross, user, -jnp.inf).astype(jnp.float32).reshape(B, P, N)

    # ---- batch-tile size: fit VMEM (double-buffered) and keep >=2 grid steps
    # when B >= 2 so both v7x TensorCores get work.
    blk_in = itemsize * (P * Dk + N * Dk + N * Dv)
    blk_out = itemsize * (P * Dv + (P * Lk if return_attn else 0))
    blk_bias = 4 * P * N if mask is not None else 0
    fixed = (4 * P * N if mask is None else 0) + (itemsize * N * Lk if return_attn else 0)
    scratch_f32 = 3 * 4 * P * N                                   # live score tiles

    def step_bytes(tb):
        return 2 * (tb * (blk_in + blk_out + blk_bias) + fixed) + tb * scratch_f32

    max_tb = B if B == 1 else max(1, B // 2)
    TB = 1
    for t in range(1, max_tb + 1):
        if B % t == 0 and step_bytes(t) <= vmem_budget_bytes:
            TB = t
    grid = (B // TB,)
    vmem_limit = int(min(64 * 2**20, max(32 * 2**20, 4 * step_bytes(TB))))

    # ---- specs
    q_spec = pl.BlockSpec((TB, P, Dk), lambda b: (b, 0, 0))
    k_spec = pl.BlockSpec((TB, N, Dk), lambda b: (b, 0, 0))
    v_spec = pl.BlockSpec((TB, N, Dv), lambda b: (b, 0, 0))
    if mask is None:
        bias_spec = pl.BlockSpec((1, P, N), lambda b: (0, 0, 0))  # shared across batch
    else:
        bias_spec = pl.BlockSpec((TB, P, N), lambda b: (b, 0, 0))
    o_spec = pl.BlockSpec((TB, P, Dv), lambda b: (b, 0, 0))

    flops = 2 * B * P * N * (Dk + Dv)
    transcendentals = B * P * N
    bytes_accessed = (itemsize * B * (P * Dk + N * Dk + N * Dv + P * Dv)
                      + 4 * int(bias.size))

    if return_attn:
        fold = jnp.tile(jnp.eye(Lk, dtype=v.dtype), (H, 1))       # (N, Lk)
        fold_spec = pl.BlockSpec((N, Lk), lambda b: (0, 0))
        a_spec = pl.BlockSpec((TB, P, Lk), lambda b: (b, 0, 0))
        kernel = functools.partial(_sdpa_kernel, scale=scale)
        in_specs = [q_spec, k_spec, v_spec, bias_spec, fold_spec]
        args = (qf, kf, vf, bias, fold)
        out_shape = (jax.ShapeDtypeStruct((B, P, Dv), dtype),
                     jax.ShapeDtypeStruct((B, P, Lk), dtype))
        out_specs = (o_spec, a_spec)
        flops += 2 * B * P * N * Lk
        bytes_accessed += itemsize * (N * Lk + B * P * Lk)
    else:
        kernel = functools.partial(_sdpa_kernel_noattn, scale=scale)
        in_specs = [q_spec, k_spec, v_spec, bias_spec]
        args = (qf, kf, vf, bias)
        out_shape = jax.ShapeDtypeStruct((B, P, Dv), dtype)
        out_specs = o_spec

    result = pl.pallas_call(
        kernel,
        out_shape=out_shape,
        grid_spec=pltpu.PrefetchScalarGridSpec(
            num_scalar_prefetch=0,
            grid=grid,
            in_specs=in_specs,
            out_specs=out_specs,
        ),
        compiler_params=pltpu.CompilerParams(
            dimension_semantics=("parallel",),
            vmem_limit_bytes=vmem_limit,
        ),
        cost_estimate=pl.CostEstimate(
            flops=flops,
            transcendentals=transcendentals,
            bytes_accessed=bytes_accessed,
        ),
    )(*args)

    if return_attn:
        out, attn = result
        return out.reshape(B, H, Lq, Dv), attn.reshape(B, H, Lq, Lk)
    return result.reshape(B, H, Lq, Dv)


def _reference(q, k, v, temperature, mask=None):
    # Pure-JAX reference matching the PyTorch forward (eval-mode dropout).
    attn = jnp.einsum("bhqd,bhkd->bhqk", q / temperature, k)
    if mask is not None:
        attn = jnp.where(mask == 0, -1e9, attn)
    attn = jax.nn.softmax(attn, axis=-1)
    out = jnp.einsum("bhqk,bhkd->bhqd", attn, v)
    return out, attn


if __name__ == "__main__":
    key = jax.random.PRNGKey(0)
    kq, kk, kv, km = jax.random.split(key, 4)

    B, H, Lq, Lk, Dk, Dv = 2, 2, 8, 8, 16, 16
    temperature = float(Dk) ** 0.5

    q = jax.random.normal(kq, (B, H, Lq, Dk), dtype=jnp.float32)
    k = jax.random.normal(kk, (B, H, Lk, Dk), dtype=jnp.float32)
    v = jax.random.normal(kv, (B, H, Lk, Dv), dtype=jnp.float32)
    # Padding-style mask shared across heads: 1 = keep, 0 = mask out.  Force the
    # first key unmasked so no row is fully masked (degenerate case, see docs).
    mask = jax.random.uniform(km, (B, 1, Lq, Lk)) > 0.25
    mask = mask.at[..., 0].set(True).astype(jnp.int32)

    # Unmasked path
    out, attn = scaled_dot_product_attention(q, k, v, temperature)
    jax.block_until_ready((out, attn))
    out_ref, attn_ref = _reference(q, k, v, temperature)
    assert jnp.allclose(out, out_ref, atol=1e-3, rtol=1e-3), "unmasked out mismatch"
    assert jnp.allclose(attn, attn_ref, atol=1e-3, rtol=1e-3), "unmasked attn mismatch"

    # Masked path
    out_m, attn_m = scaled_dot_product_attention(q, k, v, temperature, mask=mask)
    jax.block_until_ready((out_m, attn_m))
    out_mref, attn_mref = _reference(q, k, v, temperature, mask=mask)
    assert jnp.allclose(out_m, out_mref, atol=1e-3, rtol=1e-3), "masked out mismatch"
    assert jnp.allclose(attn_m, attn_mref, atol=1e-3, rtol=1e-3), "masked attn mismatch"

    # Context-only path (attention matrix neither computed nor written back)
    out_no = scaled_dot_product_attention(q, k, v, temperature, mask=mask,
                                          return_attn=False)
    jax.block_until_ready(out_no)
    assert jnp.allclose(out_no, out_mref, atol=1e-3, rtol=1e-3), "no-attn out mismatch"

    print("KERNEL_OK")
</pallas_src>

<mosaic_0001>
module attributes {stable_mosaic.version = 11 : i64} {
  func.func @_sdpa_kernel(%arg0: i32, %arg1: memref<1x16x16xf32, #tpu.memory_space<vmem>>, %arg2: memref<1x16x16xf32, #tpu.memory_space<vmem>>, %arg3: memref<1x16x16xf32, #tpu.memory_space<vmem>>, %arg4: memref<1x16x16xf32, #tpu.memory_space<vmem>>, %arg5: memref<16x8xf32, #tpu.memory_space<vmem>>, %arg6: memref<1x16x16xf32, #tpu.memory_space<vmem>>, %arg7: memref<1x16x8xf32, #tpu.memory_space<vmem>>) attributes {dimension_semantics = [#tpu.dimension_semantics<parallel>], iteration_bounds = array<i64: 2>, scalar_prefetch = 0 : i64, scratch_operands = 0 : i64, tpu.core_type = #tpu.core_type<tc>, window_params = [{transform_indices = @transform_0, window_bounds = array<i64: 1, 16, 16>}, {transform_indices = @transform_1, window_bounds = array<i64: 1, 16, 16>}, {transform_indices = @transform_2, window_bounds = array<i64: 1, 16, 16>}, {pipeline_mode = #tpu.pipeline_mode<synchronous>, transform_indices = @transform_3, window_bounds = array<i64: 1, 16, 16>}, {pipeline_mode = #tpu.pipeline_mode<synchronous>, transform_indices = @transform_4, window_bounds = array<i64: 16, 8>}, {transform_indices = @transform_5, window_bounds = array<i64: 1, 16, 16>}, {transform_indices = @transform_6, window_bounds = array<i64: 1, 16, 8>}]} {
    %c0 = arith.constant 0 : index
    %c0_0 = arith.constant 0 : index
    %c0_1 = arith.constant 0 : index
    %0 = vector.load %arg1[%c0, %c0_0, %c0_1] : memref<1x16x16xf32, #tpu.memory_space<vmem>>, vector<1x16x16xf32>
    %c0_2 = arith.constant 0 : index
    %c0_3 = arith.constant 0 : index
    %c0_4 = arith.constant 0 : index
    %1 = vector.load %arg2[%c0_2, %c0_3, %c0_4] : memref<1x16x16xf32, #tpu.memory_space<vmem>>, vector<1x16x16xf32>
    %c0_5 = arith.constant 0 : index
    %c0_6 = arith.constant 0 : index
    %c0_7 = arith.constant 0 : index
    %2 = vector.load %arg3[%c0_5, %c0_6, %c0_7] : memref<1x16x16xf32, #tpu.memory_space<vmem>>, vector<1x16x16xf32>
    %c0_8 = arith.constant 0 : index
    %c0_9 = arith.constant 0 : index
    %c0_10 = arith.constant 0 : index
    %3 = vector.load %arg4[%c0_8, %c0_9, %c0_10] : memref<1x16x16xf32, #tpu.memory_space<vmem>>, vector<1x16x16xf32>
    "tpu.trace_start"() <{level = 10 : i32, message = "bpd,bnd->bpn"}> : () -> ()
    %cst = arith.constant dense<0.000000e+00> : vector<1x16x16xf32>
    %4 = tpu.matmul %0, %1, %cst {dimension_numbers = #tpu.dot_dimension_numbers<[2], [2], [1], [1], [0, 0, 0, 1, 1, 1], [0], [0]>} : vector<1x16x16xf32>, vector<1x16x16xf32>, vector<1x16x16xf32> -> vector<1x16x16xf32>
    "tpu.trace_stop"() : () -> ()
    %cst_11 = arith.constant 2.500000e-01 : f32
    %5 = vector.broadcast %cst_11 : f32 to vector<1x16x16xf32>
    %6 = arith.mulf %4, %5 : vector<1x16x16xf32>
    %7 = arith.addf %6, %3 : vector<1x16x16xf32>
    %cst_12 = arith.constant dense<0xFF800000> : vector<1x16xf32>
    %8 = vector.multi_reduction <maximumf>, %7, %cst_12 [2] : vector<1x16x16xf32> to vector<1x16xf32>
    %9 = vector.shape_cast %8 : vector<1x16xf32> to vector<1x16x1xf32>
    %10 = vector.broadcast %9 : vector<1x16x1xf32> to vector<1x16x16xf32>
    %11 = arith.subf %7, %10 : vector<1x16x16xf32>
    %12 = math.exp %11 : vector<1x16x16xf32>
    %cst_13 = arith.constant dense<0.000000e+00> : vector<1x16xf32>
    %13 = vector.multi_reduction <add>, %12, %cst_13 [2] : vector<1x16x16xf32> to vector<1x16xf32>
    %14 = vector.shape_cast %13 : vector<1x16xf32> to vector<1x16x1xf32>
    %15 = vector.broadcast %14 : vector<1x16x1xf32> to vector<1x16x16xf32>
    %16 = arith.divf %12, %15 : vector<1x16x16xf32>
    "tpu.trace_start"() <{level = 10 : i32, message = "bpn,bnd->bpd"}> : () -> ()
    %cst_14 = arith.constant dense<0.000000e+00> : vector<1x16x16xf32>
    %17 = tpu.matmul %16, %2, %cst_14 {dimension_numbers = #tpu.dot_dimension_numbers<[2], [1], [1], [2], [0, 0, 0, 1, 1, 2], [0], [0]>} : vector<1x16x16xf32>, vector<1x16x16xf32>, vector<1x16x16xf32> -> vector<1x16x16xf32>
    "tpu.trace_stop"() : () -> ()
    %c0_15 = arith.constant 0 : index
    %c0_16 = arith.constant 0 : index
    %c0_17 = arith.constant 0 : index
    %18 = vector.load %arg6[%c0_15, %c0_16, %c0_17] : memref<1x16x16xf32, #tpu.memory_space<vmem>>, vector<1x16x16xf32>
    tpu.vector_store %arg6[%c0_15, %c0_16, %c0_17], %17 {strides = array<i32>} : memref<1x16x16xf32, #tpu.memory_space<vmem>>, vector<1x16x16xf32>,
    %19 = vector.shape_cast %16 : vector<1x16x16xf32> to vector<16x16xf32>
    %c0_18 = arith.constant 0 : index
    %c0_19 = arith.constant 0 : index
    %20 = vector.load %arg5[%c0_18, %c0_19] : memref<16x8xf32, #tpu.memory_space<vmem>>, vector<16x8xf32>
    %cst_20 = arith.constant dense<0.000000e+00> : vector<16x8xf32>
    %21 = tpu.matmul %19, %20, %cst_20 {dimension_numbers = #tpu.dot_dimension_numbers<[1], [0], [0], [1], [0, 0, 1, 1], [], []>} : vector<16x16xf32>, vector<16x8xf32>, vector<16x8xf32> -> vector<16x8xf32>
    %22 = vector.shape_cast %21 : vector<16x8xf32> to vector<1x16x8xf32>
    %c0_21 = arith.constant 0 : index
    %c0_22 = arith.constant 0 : index
    %c0_23 = arith.constant 0 : index
    %23 = vector.load %arg7[%c0_21, %c0_22, %c0_23] : memref<1x16x8xf32, #tpu.memory_space<vmem>>, vector<1x16x8xf32>
    tpu.vector_store %arg7[%c0_21, %c0_22, %c0_23], %22 {strides = array<i32>} : memref<1x16x8xf32, #tpu.memory_space<vmem>>, vector<1x16x8xf32>,
    return
  }
  func.func @transform_0(%arg0: i32) -> (i32, i32, i32) {
    %c0_i32 = arith.constant 0 : i32
    %c0_i32_0 = arith.constant 0 : i32
    %c0_i32_1 = arith.constant 0 : i32
    return %arg0, %c0_i32, %c0_i32_0 : i32, i32, i32
  }
  func.func @transform_1(%arg0: i32) -> (i32, i32, i32) {
    %c0_i32 = arith.constant 0 : i32
    %c0_i32_0 = arith.constant 0 : i32
    %c0_i32_1 = arith.constant 0 : i32
    return %arg0, %c0_i32, %c0_i32_0 : i32, i32, i32
  }
  func.func @transform_2(%arg0: i32) -> (i32, i32, i32) {
    %c0_i32 = arith.constant 0 : i32
    %c0_i32_0 = arith.constant 0 : i32
    %c0_i32_1 = arith.constant 0 : i32
    return %arg0, %c0_i32, %c0_i32_0 : i32, i32, i32
  }
  func.func @transform_3(%arg0: i32) -> (i32, i32, i32) {
    %c0_i32 = arith.constant 0 : i32
    %c0_i32_0 = arith.constant 0 : i32
    %c0_i32_1 = arith.constant 0 : i32
    %c0_i32_2 = arith.constant 0 : i32
    return %c0_i32, %c0_i32_0, %c0_i32_1 : i32, i32, i32
  }
  func.func @transform_4(%arg0: i32) -> (i32, i32) {
    %c0_i32 = arith.constant 0 : i32
    %c0_i32_0 = arith.constant 0 : i32
    %c0_i32_1 = arith.constant 0 : i32
    return %c0_i32, %c0_i32_0 : i32, i32
  }
  func.func @transform_5(%arg0: i32) -> (i32, i32, i32) {
    %c0_i32 = arith.constant 0 : i32
    %c0_i32_0 = arith.constant 0 : i32
    %c0_i32_1 = arith.constant 0 : i32
    return %arg0, %c0_i32, %c0_i32_0 : i32, i32, i32
  }
  func.func @transform_6(%arg0: i32) -> (i32, i32, i32) {
    %c0_i32 = arith.constant 0 : i32
    %c0_i32_0 = arith.constant 0 : i32
    %c0_i32_1 = arith.constant 0 : i32
    return %arg0, %c0_i32, %c0_i32_0 : i32, i32, i32
  }
}

</mosaic_0001>

<bundles_post_ra>
// kernel: tpu_custom_call.1
= control target key start
LH: loop header
LB: loop body
LE: loop exit
PB: predicated region body
PF: predicated region fallthrough
CT: control target
= control target key end

     0   :  { %s1463_s0 = inlined_call_operand.hbm [shape: f32[2,16,16], index: 0, kind: input, shape index: {}]   ;;  %s1464_s1 = inlined_call_operand.hbm [shape: f32[2,16,16], index: 1, kind: input, shape index: {}]   ;;  %s1465_s2 = inlined_call_operand.hbm [shape: f32[2,16,16], index: 2, kind: input, shape index: {}]   ;;  %s1466_s3 = inlined_call_operand.vmem [shape: f32[1,16,16], index: 3, kind: input, shape index: {}]   ;;  %s1467_s4 = inlined_call_operand.vmem [shape: f32[16,8], index: 4, kind: input, shape index: {}]   ;;  %s1468_s5 = inlined_call_operand.hbm [shape: f32[2,16,16], index: 5, kind: output, shape index: {0}]   ;;  %s1469_s6 = inlined_call_operand.vmem [shape: f32[2,16,8], index: 6, kind: output, shape index: {1}]  }
   0x1   :  { %1479 = sst [smem:[#allocation14_spill]] %s1463_s0 }
   0x2   :  { %1480 = sst [smem:[#allocation15_spill]] %s1464_s1 }
   0x3   :  { %12 = vsyncpa [#allocation3], 0 }
   0x4   :  { %14 = vsyncpa [#allocation3 + $0x1], 0 }
   0x5   :  { %15 = vsyncpa [#allocation6], 0 }
   0x6   :  { %17 = vsyncpa [#allocation6 + $0x1], 0 }
   0x7   :  { %18 = vsyncpa [#allocation4], 0 }
   0x8   :  { %20 = vsyncpa [#allocation4 + $0x1], 0  ;;  %s1165_s21 = smov 0   ;;  %s1167_s22 = smov 0  }
   0x9   :  { %s1169_s23 = smov 0   ;;  %s1171_s24 = smov 0  }
   0xa LB: > { %s1186_s25 = sadd.s32 4294967295, %s1120_s24   ;;  %s808_s26 = sadd.s32 4294967294, %s1120_s24   ;;  %s1120_s24 = sphi %s1171_s24, %s1500_s24   ;;  %s1116_s23 = sphi %s1169_s23, %s1504_s23   ;;  %s1112_s22 = sphi %s1167_s22, %s1503_s22   ;;  %s1108_s21 = sphi %s1165_s21, %s1502_s21  }
   0xb   : > { %s1190_s27 = sadd.s32 1, %s1120_s24   ;;  %s33_s28 = sadd.s32 1, %s1116_s23 }
   0xc   : > { %1481 = sst [smem:[#allocation12_spill]] %s1190_s27  ;;  %s30_s29 = ssub.s32 %s1120_s24, %s1190_s27 }
   0xd   : > { %p40_p0 = scmp.ne.s32.totalorder %s1116_s23, %s1112_s22  ;;  %p31_p1 = scmp.eq.s32.totalorder %s30_s29, 0 }
   0xe   : > { %p41_p2 = scmp.eq.s32.totalorder %s1120_s24, 0  ;;  %p46_p3 = scmp.ne.s32.totalorder %s1112_s22, %s1108_s21 }
   0xf   : > { %p47_p4 = scmp.eq.s32.totalorder %s1186_s25, 0  ;;  %p164_p7 = scmp.eq.s32.totalorder %s1186_s25, 1 }
  0x10   : > { %s1202_s30 = scalar_select %p31_p1, %s1116_s23, %s33_s28  }
  0x11   : > { %p42_p5 = por %p41_p2, %p40_p0  ;;  %p1204_p6 = por %p47_p4, %p46_p3 }
  0x12   : > { %1482 = sst [smem:[#allocation13_spill]] %s1202_s30  ;;  %p170_p8 = scmp.eq.s32.totalorder %s808_s26, 1 }
  0x13   : > { %s1483_s7 = scalar_select %p1204_p6, 1, 0 }
  0x14   : > { %p914_p10 = scmp.lt.s32.totalorder %s1120_s24, 2  ;;  %p1211_p11 = por %p164_p7, %p40_p0 }
  0x15   : > { %p1215_p12 = por %p170_p8, %p46_p3  ;;  %s1470_s10 = sand.u32 1, %s1116_s23  }
  0x16   : > { %s1484_s8 = scalar_select %p1211_p11, 1, 0 }
  0x17   : > { %s1485_s9 = scalar_select %p1215_p12, 1, 0 }
  0x18   : > { %s1221_s11 = sshll.u32 %s1120_s24, 8  ;;  %s1225_s12 = sshll.u32 %s1470_s10, 4 }
  0x19   : > { %p1227_p13 = pnand %p914_p10, %p42_p5  ;;  %s243_s14 = sand.u32 1, %s1120_s24  }
  0x1a   : > { %s1487_s1 = sld [smem:[#allocation15_spill]]  ;;  %s247_s18 = scalar_lea.vmem [#allocation5], %s1225_s12 }
  0x1b   : > { %s254_s19 = sshll.u32 %s247_s18, 4  ;;  %s1242_s20 = scalar_lea.sflag [#allocation6], %s243_s14  ;;  %s1239_s19 = int_to_ptr.vmem [resolvable:$true] %s254_s19 }
  0x1c   : > { %p1248_p2 = pneg %p1227_p13 }
  0x20   : > { %s1236_s17 = scalar_lea.hbm %s1487_s1, %s1221_s11  ;;  %s965_s16 = scalar_lea.hbm %s1487_s1, 512 }
  0x21   : > { %s960_s26 = scalar_lea.hbm %s1236_s17, 256  ;;  %p966_p5 = scmp.lt.u32.totalorder %s1236_s17, %s1487_s1 }
  0x22   : > { %p961_p1 = scmp.ne.s32.totalorder %s1236_s17, %s960_s26  ;;  %p967_p7 = scmp.lt.u32.totalorder %s965_s16, %s960_s26 }
  0x23   : > { %p969_p10 = scmp.lt.u32.totalorder %s960_s26, %s1236_s17 }
  0x24   : > { %p963_p3 = pnand %p1248_p2, %p961_p1  ;;  %p968_p8 = por %p967_p7, %p966_p5 }
  0x26   : > { %p964_p4 = pneg %p963_p3  ;;  %p970_p9 = por %p969_p10, %p968_p8 }
  0x28   : > { %p971_p0 = pnand %p970_p9, %p964_p4 }
  0x2a   : > { %974 = shalt.err (!%p971_p0)
}
  0x2b   : > { %s975_s14 = scalar_lea.vmem %s1239_s19, 256  ;;  %s1122_s29 = smov [#allocation5]  }
  0x2c   : > { %p976_p1 = scmp.ne.s32.totalorder %s1239_s19, %s975_s14  ;;  %s980_s15 = sshll.u32 %s1122_s29, 4  ;;  %s981_s15 = int_to_ptr.vmem [resolvable:$false] %s980_s15 }
  0x2d   : > { %s982_s10 = scalar_lea.vmem %s981_s15, 512  ;;  %p983_p11 = scmp.lt.s32.totalorder %s1239_s19, %s981_s15 }
  0x2e   : > { %p978_p3 = pnand %p976_p1, %p1248_p2  ;;  %p984_p6 = scmp.lt.s32.totalorder %s982_s10, %s975_s14 }
  0x30   : > { %p979_p12 = pneg %p978_p3  ;;  %p985_p5 = por %p984_p6, %p983_p11 }
  0x32   : > { %p986_p7 = pnand %p985_p5, %p979_p12 }
  0x34   : > { %989 = shalt.err (!%p986_p7)
}
  0x35   : > { %s1473_s26 = smov 128   ;;  %s1475_s16 = smov 8  }
  0x36   : > { %906 = dma.hbm_to_vmem [thread:$0]  (!%p1227_p13), %s1236_s17, 256, %s1239_s19, %s1242_s20, %s1473_s26, %s1473_s26, %s1475_s16  }
  0x37   : > { %p283_p6 = scmp.lt.s32.totalorder %s1120_s24, 3  ;;  %s1489_s0 = sld [smem:[#allocation14_spill]] }
  0x38   : > { %p1490_p9 = scmp.ge.s32.totalorder %s1120_s24, 1  ;;  %s226_s10 = scalar_lea.vmem [#allocation2], %s1225_s12 }
  0x39   : > { %s233_s1 = sshll.u32 %s226_s10, 4  ;;  %s1492_s17 = sand.u32 1, %s1116_s23   ;;  %s1289_s1 = int_to_ptr.vmem [resolvable:$true] %s233_s1 }
  0x3a   : > { %p1284_p11 = pnand %p1490_p9, %p283_p6  ;;  %s1293_s19 = scalar_lea.sflag [#allocation3], %s1492_s17 }
  0x3c   : > { %s1491_s15 = scalar_select %p1284_p11, 1, 0 }
  0x3d   : > { %s1280_s29 = scalar_lea.hbm %s1489_s0, %s1221_s11  ;;  %s995_s16 = scalar_lea.hbm %s1489_s0, 512 }
  0x3e   : > { %s990_s26 = scalar_lea.hbm %s1280_s29, 256  ;;  %p996_p8 = scmp.lt.u32.totalorder %s1280_s29, %s1489_s0 }
  0x3f   : > { %p991_p12 = scmp.ne.s32.totalorder %s1280_s29, %s990_s26  ;;  %p997_p10 = scmp.lt.u32.totalorder %s995_s16, %s990_s26 }
  0x40   : > { %p999_p3 = scmp.lt.u32.totalorder %s990_s26, %s1280_s29 }
  0x41   : > { %p993_p0 = pnand %p991_p12, %p1248_p2  ;;  %p998_p1 = por %p997_p10, %p996_p8 }
  0x43   : > { %p994_p4 = pneg %p993_p0  ;;  %p1000_p5 = por %p999_p3, %p998_p1 }
  0x45   : > { %p1001_p7 = pnand %p1000_p5, %p994_p4 }
  0x47   : > { %1004 = shalt.err (!%p1001_p7)
}
  0x48   : > { %s1005_s10 = scalar_lea.vmem %s1289_s1, 256  ;;  %s1125_s17 = smov [#allocation2]  }
  0x49   : > { %p1006_p6 = scmp.ne.s32.totalorder %s1289_s1, %s1005_s10  ;;  %s1010_s18 = sshll.u32 %s1125_s17, 4  ;;  %s1011_s18 = int_to_ptr.vmem [resolvable:$false] %s1010_s18 }
  0x4a   : > { %s1012_s27 = scalar_lea.vmem %s1011_s18, 512  ;;  %p1013_p0 = scmp.lt.s32.totalorder %s1289_s1, %s1011_s18 }
  0x4b   : > { %p1008_p9 = pnand %p1006_p6, %p1248_p2  ;;  %p1014_p11 = scmp.lt.s32.totalorder %s1012_s27, %s1005_s10 }
  0x4d   : > { %p1009_p12 = pneg %p1008_p9  ;;  %p1015_p8 = por %p1014_p11, %p1013_p0 }
  0x4f   : > { %p1016_p10 = pnand %p1015_p8, %p1009_p12 }
  0x51   : > { %1019 = shalt.err (!%p1016_p10)
}
  0x52   : > { %s1493_s30 = smov 8   ;;  %s1494_s26 = smov 128  }
  0x53   : > { %903 = dma.hbm_to_vmem [thread:$0]  (!%p1227_p13), %s1280_s29, 256, %s1289_s1, %s1293_s19, %s1494_s26, %s1494_s26, %s1493_s30  }
  0x54   : > { %s1324_s17 = scalar_lea.hbm %s1465_s2, %s1221_s11  ;;  %s268_s10 = scalar_lea.vmem [#allocation7], %s1225_s12 }
  0x55   : > { %s275_s18 = sshll.u32 %s268_s10, 4  ;;  %s1020_s27 = scalar_lea.hbm %s1324_s17, 256  ;;  %s1327_s18 = int_to_ptr.vmem [resolvable:$true] %s275_s18 }
  0x56   : > { %p1021_p11 = scmp.ne.s32.totalorder %s1324_s17, %s1020_s27  ;;  %s1025_s29 = scalar_lea.hbm %s1465_s2, 512 }
  0x57   : > { %p1026_p3 = scmp.lt.u32.totalorder %s1324_s17, %s1465_s2  ;;  %p1027_p5 = scmp.lt.u32.totalorder %s1025_s29, %s1020_s27 }
  0x58   : > { %p1023_p4 = pnand %p1021_p11, %p1248_p2  ;;  %p1029_p6 = scmp.lt.u32.totalorder %s1020_s27, %s1324_s17 }
  0x59   : > { %p1028_p7 = por %p1027_p5, %p1026_p3 }
  0x5a   : > { %p1024_p1 = pneg %p1023_p4 }
  0x5b   : > { %p1030_p9 = por %p1029_p6, %p1028_p7 }
  0x5d   : > { %p1031_p12 = pnand %p1030_p9, %p1024_p1 }
  0x5f   : > { %1034 = shalt.err (!%p1031_p12)
}
  0x60   : > { %s1035_s12 = scalar_lea.vmem %s1327_s18, 256  ;;  %s1126_s0 = smov [#allocation7]  }
  0x61   : > { %p1036_p0 = scmp.ne.s32.totalorder %s1327_s18, %s1035_s12  ;;  %s1040_s16 = sshll.u32 %s1126_s0, 4  ;;  %s1041_s16 = int_to_ptr.vmem [resolvable:$false] %s1040_s16 }
  0x62   : > { %s1042_s14 = scalar_lea.vmem %s1041_s16, 512  ;;  %p1043_p11 = scmp.lt.s32.totalorder %s1327_s18, %s1041_s16 }
  0x63   : > { %p1038_p8 = pnand %p1036_p0, %p1248_p2  ;;  %p1044_p4 = scmp.lt.s32.totalorder %s1042_s14, %s1035_s12 }
  0x65   : > { %p1039_p10 = pneg %p1038_p8  ;;  %p1045_p3 = por %p1044_p4, %p1043_p11 }
  0x67   : > { %p1046_p5 = pnand %p1045_p3, %p1039_p10 }
  0x69   : > { %1049 = shalt.err (!%p1046_p5)
}
  0x6a   : > { %909 = dma.hbm_to_vmem [thread:$0]  (!%p1227_p13), %s1324_s17, 256, %s1327_s18, %s1242_s20, %s1494_s26, %s1494_s26, %s1493_s30  }
  0x6b   : > { %p1495_p2 = scmp.ne.s32.totalorder %s1491_s15, 0 }
  0x6c   : > { %s1357_s28 = sand.u32 (!%p1495_p2), 1, %s1112_s22   ;;  %p1496_p1 = scmp.ne.s32.totalorder (!%p1495_p2), %s1483_s7, 0 }
  0x6d   : > { %287 = sbr.rel (%p1495_p2) target bundleno = 895 (0x37f), region = 40  ;;  %s1360_s10 = sshll.u32 (!%p1495_p2), %s1357_s28, 4 }
  0x6e   : > { %s290_s13 = scalar_lea.sflag (!%p1495_p2), [#allocation3], %s1357_s28  ;;  %s293_s27 = scalar_lea.vmem (!%p1495_p2), [#allocation2], %s1360_s10 }
  0x74   : > { %1095 = dma.done.wait (%p1496_p1), %s290_s13, 256  }
  0x75   : > { %1097 = vsyncadd (%p1496_p1), %s290_s13, 4294967040  ;;  %s298_s20 = sand.u32 1, %s1186_s25   ;;  %s302_s30 = scalar_lea.vmem [#allocation5], %s1360_s10 }
  0x76   : > { %s299_s15 = scalar_lea.sflag [#allocation6], %s298_s20 }
  0x77   : > { %1099 = dma.done.wait (%p1496_p1), %s299_s15, 512  }
  0x78   : > { %1101 = vsyncadd (%p1496_p1), %s299_s15, 4294966784  ;;  %vm368_vm0 = vcmask 130048   ;;  %v362_v0 = vld [vmem:[%s302_s30] sm:$0xff]  ;;  %v363_v1 = vld [vmem:[%s302_s30 + $0x8] sm:$0xff]  ;;  %s311_s1 = scalar_lea.vmem [#allocation7], %s1360_s10  ;;  %p355_p13 = scmp.lt.s32.totalorder %s1186_s25, 1 }
  0x79   : > { %vm879_vm1 = vmpackc.low %vm368_vm0, %vm368_vm0  ;;  %v360_v2 = vld [vmem:[%s293_s27] sm:$0xff]  ;;  %v878_v3 = vpack.c.bf16 %v363_v1, %v362_v0  ;;  %v361_v4 = vld [vmem:[%s293_s27 + $0x8] sm:$0xff]  ;;  %s347_s16 = scalar_lea.vmem [#allocation8], %s1360_s10  ;;  %s844_s13 = sshll.u32 %s1186_s25, 8  ;;  %vm642_vm2 = vcmask 64512  }
  0x7a   : > { %861 = vmatprep.mubr.msk.f32.mxu0 %vm368_vm0, %v360_v2  ;;  %v366_v7 = vld [vmem:[%s1466_s3] sm:$0xff]  ;;  %v367_v10 = vld [vmem:[%s1466_s3 + $0x8] sm:$0xff]  ;;  %s356_s0 = scalar_select %p355_p13, %s1186_s25, 1 }
  0x7b   : > { %880 = vmatprep.subr.msk.bf16.mxu0 %vm879_vm1, %v878_v3  ;;  %v364_v25 = vld [vmem:[%s311_s1] sm:$0xff]  ;;  %v365_v26 = vld [vmem:[%s311_s1 + $0x8] sm:$0xff]  ;;  %s664_s14 = sshll.u32 %s347_s16, 4  ;;  %s1408_s30 = scalar_lea.hbm %s1468_s5, %s844_s13  ;;  %s1403_s14 = int_to_ptr.vmem [resolvable:$true] %s664_s14 }
  0x7c   : > { %883 = vmatpush3.bf16.xpose.msk.msra.mxu0 %vm879_vm1, %v878_v3  ;;  %v884_v27 = vpack.c.bf16 %v365_v26, %v364_v25  ;;  %v565_v28 = vld [vmem:[%s1467_s4] sm:$0xff]  ;;  %v566_v29 = vld [vmem:[%s1467_s4 + $0x8] sm:$0xff]  ;;  %s843_s27 = sshll.u32 %s356_s0, 4  ;;  %s646_s7 = scalar_lea.sflag [#allocation4], %s1357_s28 }
  0x7d   : > { %v888_v30 = vpack.c.bf16 %v566_v29, %v565_v28  ;;  %s1415_s25 = scalar_lea.vmem %s1469_s6, %s843_s27  ;;  %s1050_s17 = scalar_lea.vmem %s1403_s14, 256 }
  0x7e   : > { %885 = vmatprep.subr.bf16.mxu1 %v884_v27  ;;  %p1051_p7 = scmp.ne.s32.totalorder %s1403_s14, %s1050_s17  ;;  %p1497_p6 = scmp.ne.s32.totalorder %s1484_s8, 0 }
  0x7f   : > { %887 = vmatpush3.bf16.msra.mxu1 %v884_v27  ;;  %s1127_s18 = smov [#allocation8]  }
  0x80   : > { %889 = vmatprep.subr.bf16.mxu1 %v888_v30  ;;  %p1052_p9 = pnand %p1051_p7, %p1497_p6  ;;  %s1054_s1 = sshll.u32 %s1127_s18, 4  ;;  %s1055_s1 = int_to_ptr.vmem [resolvable:$false] %s1054_s1 }
  0x81   : > { %s1056_s29 = scalar_lea.vmem %s1055_s1, 512  ;;  %p1057_p0 = scmp.lt.s32.totalorder %s1403_s14, %s1055_s1 }
  0x82   : > { %p1053_p12 = pneg %p1052_p9  ;;  %p1058_p8 = scmp.lt.s32.totalorder %s1056_s29, %s1050_s17 }
  0x83   : > { %862 = vmatmul.mubr.msk.f32.vlgmr.msra.gmra.mrb[0].mxu0 %vm368_vm0, %v361_v4 }
  0x84   : > { %p1059_p10 = por %p1058_p8, %p1057_p0 }
  0x86   : > { %p1060_p11 = pnand %p1059_p10, %p1053_p12 }
 0x156   : > { %v863_v5 = vpop.f32.mrb[0].mxu0 }
 0x157   : > { %v447_v6 = vpop.f32.mrb[1].mxu0  ;;  %v457_v8 = vmul.f32 0.25, %v863_v5 }
 0x158   : > { %v456_v9 = vmul.f32 0.25, %v447_v6 }
 0x159   : > { %v459_v13 = vadd.f32 %v457_v8, %v367_v10 }
 0x15a   : > { %v458_v11 = vadd.f32 %v456_v9, %v366_v7 }
 0x15b   : > { %v463_v14 = vsel %vm368_vm0, %v459_v13, -inf }
 0x15c   : > { %v460_v12 = vsel %vm368_vm0, %v458_v11, -inf }
 0x15d   : > { %461 = vmax.xlane.f32.xlu0 %v460_v12 }
 0x161   : > { %464 = vmax.xlane.f32.xlu0 %v463_v14 }
 0x1ea   : > { %v462_v15 = vpop.xlane.xlu0 %461 }
 0x1eb   : > { %v466_v16 = vsub.f32 %v458_v11, %v462_v15 }
 0x1ed   : > { %v468_v17 = vmul.f32 1.442695, %v466_v16 }
 0x1ee   : > { %v465_v18 = vpop.xlane.xlu0 %464 }
 0x1ef   : > { %952 = vpow2.f32 %v468_v17  ;;  %v467_v19 = vsub.f32 %v459_v13, %v465_v18 }
 0x1f1   : > { %v470_v20 = vmul.f32 1.442695, %v467_v19 }
 0x1f3   : > { %954 = vpow2.f32 %v470_v20 }
 0x1f9   : > { %v953_v21 = vpop.eup %952 }
 0x1fa   : > { %v472_v22 = vsel %vm368_vm0, %v953_v21, 0.0 }
 0x1fb   : > { %473 = vadd.xlane.f32.xlu1 %v472_v22 }
 0x1fd   : > { %v955_v23 = vpop.eup %954 }
 0x1fe   : > { %v475_v24 = vsel %vm368_vm0, %v955_v23, 0.0 }
 0x1ff   : > { %476 = vadd.xlane.f32.xlu1 %v475_v24 }
 0x288   : > { %v474_v31 = vpop.xlane.xlu1 %473 }
 0x289   : > { %956 = vrcp.f32 %v474_v31 }
 0x28c   : > { %v477_v32 = vpop.xlane.xlu1 %476 }
 0x28d   : > { %958 = vrcp.f32 %v477_v32 }
 0x293   : > { %v957_v33 = vpop.eup %956 }
 0x294   : > { %v479_v34 = vmul.f32 %v957_v33, %v953_v21 }
 0x296   : > { %868 = vmatprep.mubr.msk.f32.mxu1 %vm368_vm0, %v479_v34 }
 0x297   : > { %v959_v35 = vpop.eup %958 }
 0x298   : > { %v481_v36 = vmul.f32 %v959_v35, %v955_v23 }
 0x29a   : > { %869 = vmatmul.mubr.msk.f32.vlgmr.msra.gmra.mrb[0].mxu1 %vm368_vm0, %v481_v36 }
 0x29b   : > { %891 = vmatpush3.bf16.msra.mxu1 %v888_v30  ;;  %875 = vmatprep.mubr.msk.f32.mxu1 %vm368_vm0, %v479_v34 }
 0x29e   : > { %876 = vmatmul.mubr.msk.f32.vlgmr.msra.gmra.mrb[2].mxu1 %vm368_vm0, %v481_v36 }
 0x36d   : > { %v870_v37 = vpop.f32.mrb[0].mxu1 }
 0x36e   : > { %564 = vst.msk [vmem:[%s347_s16 + $0x8] sm:$0xff] %vm368_vm0, %v870_v37  ;;  %v554_v38 = vpop.f32.mrb[1].mxu1 }
 0x36f   : > { %563 = vst.msk [vmem:[%s347_s16] sm:$0xff] %vm368_vm0, %v554_v38 }
 0x370   : > { %1063 = shalt.err (!%p1060_p11)
}
 0x371   : > { %s1064_s19 = scalar_lea.hbm %s1408_s30, 256  ;;  %s1068_s0 = scalar_lea.hbm %s1468_s5, 512 }
 0x372   : > { %p1065_p4 = scmp.ne.s32.totalorder %s1408_s30, %s1064_s19  ;;  %p1069_p2 = scmp.lt.u32.totalorder %s1408_s30, %s1468_s5 }
 0x373   : > { %p1070_p1 = scmp.lt.u32.totalorder %s1068_s0, %s1064_s19  ;;  %p1072_p7 = scmp.lt.u32.totalorder %s1064_s19, %s1408_s30 }
 0x374   : > { %p1066_p3 = pnand %p1065_p4, %p1497_p6 }
 0x375   : > { %p1071_p13 = por %p1070_p1, %p1069_p2 }
 0x376   : > { %p1067_p5 = pneg %p1066_p3 }
 0x377   : > { %p1073_p9 = por %p1072_p7, %p1071_p13 }
 0x379   : > { %p1074_p12 = pnand %p1073_p9, %p1067_p5 }
 0x37b   : > { %1077 = shalt.err (!%p1074_p12)
}
 0x37c   : > { %s1128_s27 = smov 128   ;;  %s1129_s20 = smov 8   ;;  %v877_v39 = vpop.f32.mrb[2].mxu1 }
 0x37d   : > { %898 = dma.vmem_to_hbm [thread:$0]  (%p1497_p6), %s1403_s14, 256, %s1408_s30, %s646_s7, %s1128_s27, %s1128_s27, %s1129_s20   ;;  %v633_v40 = vpop.f32.mrb[3].mxu1 }
 0x37e   : > { %644 = vst.msk [vmem:[%s1415_s25 + $0x8] sm:$0xff] %vm642_vm2, %v877_v39  ;;  %643 = vst.msk [vmem:[%s1415_s25] sm:$0xff] %vm642_vm2, %v633_v40 }
 0x37f PF: > { %s682_s15 = sand.u32 1, %s1108_s21   ;;  %p1498_p0 = scmp.ne.s32.totalorder %s1485_s9, 0 }
 0x380   : > { %p1499_p8 = scmp.ge.s32.totalorder %s1120_s24, 2  ;;  %s683_s10 = scalar_lea.sflag [#allocation4], %s682_s15 }
 0x382   : > { %p911_p10 = pnand %p1499_p8, %p1498_p0 }
 0x384   : > { %1103 = dma.done.wait (!%p911_p10), %s683_s10, 256  }
 0x385   : > { %1105 = vsyncadd (!%p911_p10), %s683_s10, 4294967040  ;;  %s1500_s24 = sld [smem:[#allocation12_spill]]  ;;  %s1501_s8 = sld [smem:[#allocation13_spill]] }
 0x386   : > { %s1502_s21 = smov %s1112_s22  ;;  %s1503_s22 = smov %s1116_s23 }
 0x38b   : > { %p23_p6 = scmp.ge.s32.totalorder %s1500_s24, 4   ;;  %s1504_s23 = smov %s1501_s8 }
 0x38d   :  { %25 = sbr.rel (!%p23_p6) target bundleno = 10 (0xa), region = 121 }
 0x394   :  { %696 = vsyncpa [#allocation3], 1 }
 0x395   :  { %698 = vsyncpa [#allocation3 + $0x1], 1 }
 0x396   :  { %699 = vsyncpa [#allocation6], 1 }
 0x397   :  { %701 = vsyncpa [#allocation6 + $0x1], 1 }
 0x398   :  { %702 = vsyncpa [#allocation4], 1 }
 0x399   :  { %704 = vsyncpa [#allocation4 + $0x1], 1 }

</bundles_post_ra>
